<compile_context>
chip_gen: v5e
topology: v5e:2x2
jax: 0.10.0
libtpu: 0.0.40
codegen_flags: <defaults>
</compile_context>

<pallas_src>
import functools

import jax
import jax.numpy as jnp
from jax.experimental import pallas as pl
from jax.experimental.pallas import tpu as pltpu


def lstm_kernel(p_ref, whh_ref, out_ref, cn_ref, h_sc, c_sc):
    # p_ref:   (B_BLK, T_BLK*4H)  lane-dense precomputed x@W_ih^T + (b_ih+b_hh)
    #                             gate columns permuted to (i, f, o, g)
    # whh_ref: (H, 4H)            W_hh^T (same gate permutation), resident
    # out_ref: (B_BLK, T_BLK*H)   lane-dense output slab for this block
    # cn_ref:  (B_BLK, H)         final cell state (resident across time)
    # h_sc/c_sc: (B_BLK, H) f32   recurrent state carried across time blocks
    H = whh_ref.shape[0]
    G4 = 4 * H
    b_blk = h_sc.shape[0]
    t_blk = out_ref.shape[1] // H

    @pl.when(pl.program_id(1) == 0)
    def _():
        h_sc[...] = jnp.zeros_like(h_sc)
        c_sc[...] = jnp.zeros_like(c_sc)

    whh = whh_ref[...]
    mxu_dtype = whh.dtype

    # Two independent batch sub-streams (when each half stays sublane-aligned):
    # the second stream fills MXU-pop / EUP bubbles of the first stream's
    # serial vmatmul -> sigmoid/tanh -> cell-update chain.
    n_streams = 2 if (b_blk % 16 == 0) else 1
    sub = b_blk // n_streams

    h = [h_sc[s * sub:(s + 1) * sub, :] for s in range(n_streams)]
    c = [c_sc[s * sub:(s + 1) * sub, :] for s in range(n_streams)]

    for t in range(t_blk):  # static unroll: static slices, scheduler visibility
        p_t = p_ref[:, t * G4:(t + 1) * G4]       # 128-aligned lane slice
        gates = []
        for s in range(n_streams):
            g = jnp.dot(h[s].astype(mxu_dtype), whh,
                        preferred_element_type=jnp.float32)
            g = g + p_t[s * sub:(s + 1) * sub, :].astype(jnp.float32)
            gates.append(g)
        for s in range(n_streams):
            g = gates[s]
            # Gate order (i, f, o, g): one wide sigmoid + one tanh dispatch.
            sig = jax.nn.sigmoid(g[:, :3 * H])
            g_g = jnp.tanh(g[:, 3 * H:])
            i_g = sig[:, 0 * H:1 * H]
            f_g = sig[:, 1 * H:2 * H]
            o_g = sig[:, 2 * H:3 * H]
            c[s] = f_g * c[s] + i_g * g_g
            h[s] = o_g * jnp.tanh(c[s])
            # Per-step store into the slab: uses the otherwise-idle vst slot,
            # keeps vreg pressure flat (no end-of-block concat/relayout).
            out_ref[s * sub:(s + 1) * sub, t * H:(t + 1) * H] = (
                h[s].astype(out_ref.dtype))

    for s in range(n_streams):
        h_sc[s * sub:(s + 1) * sub, :] = h[s]
        c_sc[s * sub:(s + 1) * sub, :] = c[s]

    @pl.when(pl.program_id(1) == pl.num_programs(1) - 1)
    def _():
        cn_ref[...] = c_sc[...].astype(cn_ref.dtype)


def lstm_pallas(x, w_ih, w_hh, b_ih, b_hh, *, t_blk=None, b_blk=None,
                mxu_dtype=jnp.bfloat16):
    """x: (B, S, I); w_ih: (4H, I); w_hh: (4H, H); b_*: (4H,).

    Returns (outputs (B,S,H), (h_n (1,B,H), c_n (1,B,H))) like nn.LSTM
    (batch_first=True, zero initial states). mxu_dtype controls the storage
    dtype of P / W_hh^T and the matmul operand dtype; state & accumulation
    stay f32.
    """
    B, S, I = x.shape
    H = w_hh.shape[1]
    G4 = 4 * H

    if t_blk is None:
        t_blk = S if S <= 32 else 8
    if b_blk is None:
        b_blk = B
    assert S % t_blk == 0 and B % b_blk == 0
    # (8,128)-rule on blocked dims (full-extent blocks are always OK).
    assert b_blk == B or b_blk % 8 == 0
    assert t_blk == S or (t_blk * H) % 128 == 0

    # Permute gate rows once so the kernel sees (i, f, o, g): sigmoid gets one
    # contiguous [:, :3H] slice, tanh gets [:, 3H:].
    perm = jnp.concatenate([
        jnp.arange(0 * H, 1 * H),   # i
        jnp.arange(1 * H, 2 * H),   # f
        jnp.arange(3 * H, 4 * H),   # o
        jnp.arange(2 * H, 3 * H),   # g
    ])
    w_ih_p = w_ih[perm]
    w_hh_p = w_hh[perm]
    bias_p = (b_ih + b_hh)[perm]

    # Hoist the input projection out of the serial recurrence: one big matmul
    # over all timesteps (also absorbs the old (S,B,I) transpose). Stored
    # lane-dense (B, S*4H) and in mxu_dtype to halve the dominant HBM stream.
    p = jnp.einsum("bsi,gi->bsg", x, w_ih_p) + bias_p          # (B, S, 4H) f32
    p = p.reshape(B, S * G4).astype(mxu_dtype)                 # lane-dense
    whh_t = w_hh_p.T.astype(mxu_dtype)                         # (H, 4H)

    grid = (B // b_blk, S // t_blk)

    # Explicit VMEM budget (double-buffered blocks + resident weight + scratch).
    in_isz = jnp.dtype(mxu_dtype).itemsize
    out_isz = jnp.dtype(x.dtype).itemsize
    vmem_bytes = (
        2 * b_blk * t_blk * G4 * in_isz      # P blocks
        + 2 * H * G4 * in_isz                # W_hh^T (resident, conservatively x2)
        + 2 * b_blk * t_blk * H * out_isz    # output slabs
        + 2 * b_blk * H * out_isz            # c_n
        + 2 * b_blk * H * 4                  # h/c f32 scratch
    )
    vmem_limit = min(max(2 * vmem_bytes + (4 << 20), 32 << 20), 64 << 20)

    out2d, c_n = pl.pallas_call(
        lstm_kernel,
        out_shape=(
            jax.ShapeDtypeStruct((B, S * H), x.dtype),   # lane-dense outputs
            jax.ShapeDtypeStruct((B, H), x.dtype),       # final cell state
        ),
        grid_spec=pltpu.PrefetchScalarGridSpec(
            num_scalar_prefetch=0,
            grid=grid,
            in_specs=[
                pl.BlockSpec((b_blk, t_blk * G4), lambda b, t: (b, t)),
                pl.BlockSpec((H, G4), lambda b, t: (0, 0)),  # resident W_hh^T
            ],
            out_specs=(
                pl.BlockSpec((b_blk, t_blk * H), lambda b, t: (b, t)),
                pl.BlockSpec((b_blk, H), lambda b, t: (b, 0)),
            ),
            scratch_shapes=[
                pltpu.VMEM((b_blk, H), jnp.float32),   # h state
                pltpu.VMEM((b_blk, H), jnp.float32),   # c state
            ],
        ),
        compiler_params=pltpu.CompilerParams(
            # Batch is embarrassingly parallel (2nd TC on v7x); the time
            # recurrence must stay sequential.
            dimension_semantics=("parallel", "arbitrary"),
            vmem_limit_bytes=int(vmem_limit)),
    )(p, whh_t)

    outputs = out2d.reshape(B, S, H)     # free row-major reshape, no HBM pass
    h_n = outputs[:, -1, :][None]        # (1, B, H)
    return outputs, (h_n, c_n[None])


def lstm_ref(x, w_ih, w_hh, b_ih, b_hh):
    """Pure-JAX reference matching PyTorch nn.LSTM semantics."""
    B, S, I = x.shape
    H = w_hh.shape[1]

    def step(carry, x_t):
        h, c = carry
        gates = x_t @ w_ih.T + b_ih + h @ w_hh.T + b_hh
        i = jax.nn.sigmoid(gates[:, :H])
        f = jax.nn.sigmoid(gates[:, H:2 * H])
        g = jnp.tanh(gates[:, 2 * H:3 * H])
        o = jax.nn.sigmoid(gates[:, 3 * H:])
        c = f * c + i * g
        h = o * jnp.tanh(c)
        return (h, c), h

    init = (jnp.zeros((B, H), x.dtype), jnp.zeros((B, H), x.dtype))
    (h, c), ys = jax.lax.scan(step, init, jnp.transpose(x, (1, 0, 2)))
    return jnp.transpose(ys, (1, 0, 2)), (h[None], c[None])


if __name__ == "__main__":
    # Small shapes consistent with the module: batch=4, seq=8,
    # input_size=16, hid_size=32  (4H = 128, lane-friendly; B*H = 128).
    B, S, I, H = 4, 8, 16, 32
    key = jax.random.PRNGKey(0)
    kx, k1, k2, k3, k4 = jax.random.split(key, 5)

    bound = 1.0 / jnp.sqrt(jnp.float32(H))
    x = jax.random.normal(kx, (B, S, I), dtype=jnp.float32)
    w_ih = jax.random.uniform(k1, (4 * H, I), jnp.float32, -bound, bound)
    w_hh = jax.random.uniform(k2, (4 * H, H), jnp.float32, -bound, bound)
    b_ih = jax.random.uniform(k3, (4 * H,), jnp.float32, -bound, bound)
    b_hh = jax.random.uniform(k4, (4 * H,), jnp.float32, -bound, bound)

    ref_out, (ref_h, ref_c) = lstm_ref(x, w_ih, w_hh, b_ih, b_hh)

    # f32 MXU path: tight check against the f32 reference.
    run_f32 = jax.jit(functools.partial(lstm_pallas, mxu_dtype=jnp.float32))
    out32, (h32, c32) = run_f32(x, w_ih, w_hh, b_ih, b_hh)
    jax.block_until_ready((out32, h32, c32))
    assert out32.shape == (B, S, H)
    assert h32.shape == (1, B, H) and c32.shape == (1, B, H)
    assert jnp.allclose(out32, ref_out, atol=1e-4, rtol=1e-4)
    assert jnp.allclose(h32, ref_h, atol=1e-4, rtol=1e-4)
    assert jnp.allclose(c32, ref_c, atol=1e-4, rtol=1e-4)

    # Default bf16-MXU / f32-state path (production): looser tolerance.
    run_bf16 = jax.jit(lstm_pallas)
    outputs, (h_n, c_n) = run_bf16(x, w_ih, w_hh, b_ih, b_hh)
    jax.block_until_ready((outputs, h_n, c_n))
    assert outputs.shape == (B, S, H)
    assert h_n.shape == (1, B, H) and c_n.shape == (1, B, H)
    assert jnp.allclose(outputs, ref_out, atol=5e-2, rtol=5e-2)
    assert jnp.allclose(h_n, ref_h, atol=5e-2, rtol=5e-2)
    assert jnp.allclose(c_n, ref_c, atol=5e-2, rtol=5e-2)

    print("KERNEL_OK")
</pallas_src>

<mosaic_0001>
module attributes {stable_mosaic.version = 11 : i64} {
  func.func @lstm_kernel(%arg0: i32, %arg1: i32, %arg2: memref<4x1024xf32, #tpu.memory_space<vmem>>, %arg3: memref<32x128xf32, #tpu.memory_space<vmem>>, %arg4: memref<4x256xf32, #tpu.memory_space<vmem>>, %arg5: memref<4x32xf32, #tpu.memory_space<vmem>>, %arg6: memref<4x32xf32, #tpu.memory_space<vmem>>, %arg7: memref<4x32xf32, #tpu.memory_space<vmem>>) attributes {dimension_semantics = [#tpu.dimension_semantics<parallel>, #tpu.dimension_semantics<arbitrary>], iteration_bounds = array<i64: 1, 1>, scalar_prefetch = 0 : i64, scratch_operands = 2 : i64, tpu.core_type = #tpu.core_type<tc>, window_params = [{transform_indices = @transform_0, window_bounds = array<i64: 4, 1024>}, {pipeline_mode = #tpu.pipeline_mode<synchronous>, transform_indices = @transform_1, window_bounds = array<i64: 32, 128>}, {transform_indices = @transform_2, window_bounds = array<i64: 4, 256>}, {transform_indices = @transform_3, window_bounds = array<i64: 4, 32>}]} {
    %c0_i32 = arith.constant 0 : i32
    %0 = arith.cmpi eq, %arg1, %c0_i32 : i32
    %1 = arith.extui %0 : i1 to i32
    %c0_i32_0 = arith.constant 0 : i32
    %2 = arith.cmpi ne, %1, %c0_i32_0 : i32
    scf.if %2 {
      %cst_46 = arith.constant 0.000000e+00 : f32
      %171 = vector.broadcast %cst_46 : f32 to vector<4x32xf32>
      %c0_47 = arith.constant 0 : index
      %c0_48 = arith.constant 0 : index
      %172 = vector.load %arg6[%c0_47, %c0_48] : memref<4x32xf32, #tpu.memory_space<vmem>>, vector<4x32xf32>
      tpu.vector_store %arg6[%c0_47, %c0_48], %171 {strides = array<i32>} : memref<4x32xf32, #tpu.memory_space<vmem>>, vector<4x32xf32>,
      %cst_49 = arith.constant 0.000000e+00 : f32
      %173 = vector.broadcast %cst_49 : f32 to vector<4x32xf32>
      %c0_50 = arith.constant 0 : index
      %c0_51 = arith.constant 0 : index
      %174 = vector.load %arg7[%c0_50, %c0_51] : memref<4x32xf32, #tpu.memory_space<vmem>>, vector<4x32xf32>
      tpu.vector_store %arg7[%c0_50, %c0_51], %173 {strides = array<i32>} : memref<4x32xf32, #tpu.memory_space<vmem>>, vector<4x32xf32>,
    } else {
    }
    %c0 = arith.constant 0 : index
    %c0_1 = arith.constant 0 : index
    %3 = vector.load %arg3[%c0, %c0_1] : memref<32x128xf32, #tpu.memory_space<vmem>>, vector<32x128xf32>
    %c0_2 = arith.constant 0 : index
    %c0_3 = arith.constant 0 : index
    %4 = vector.load %arg6[%c0_2, %c0_3] : memref<4x32xf32, #tpu.memory_space<vmem>>, vector<4x32xf32>
    %c0_4 = arith.constant 0 : index
    %c0_5 = arith.constant 0 : index
    %5 = vector.load %arg7[%c0_4, %c0_5] : memref<4x32xf32, #tpu.memory_space<vmem>>, vector<4x32xf32>
    %c0_6 = arith.constant 0 : index
    %c0_7 = arith.constant 0 : index
    %6 = vector.load %arg2[%c0_6, %c0_7] : memref<4x1024xf32, #tpu.memory_space<vmem>>, vector<4x128xf32>
    %cst = arith.constant dense<0.000000e+00> : vector<4x128xf32>
    %7 = tpu.matmul %4, %3, %cst {dimension_numbers = #tpu.dot_dimension_numbers<[1], [0], [0], [1], [0, 0, 1, 1], [], []>} : vector<4x32xf32>, vector<32x128xf32>, vector<4x128xf32> -> vector<4x128xf32>
    %8 = arith.addf %7, %6 : vector<4x128xf32>
    %9 = vector.extract_strided_slice %8 {offsets = [0, 0], sizes = [4, 96], strides = [1, 1]} : vector<4x128xf32> to vector<4x96xf32>
    %10 = arith.negf %9 : vector<4x96xf32>
    %11 = math.exp %10 : vector<4x96xf32>
    %cst_8 = arith.constant 1.000000e+00 : f32
    %12 = vector.broadcast %cst_8 : f32 to vector<4x96xf32>
    %13 = arith.addf %12, %11 : vector<4x96xf32>
    %14 = arith.divf %12, %13 : vector<4x96xf32>
    %15 = vector.extract_strided_slice %8 {offsets = [0, 96], sizes = [4, 32], strides = [1, 1]} : vector<4x128xf32> to vector<4x32xf32>
    %16 = math.tanh %15 : vector<4x32xf32>
    %17 = vector.extract_strided_slice %14 {offsets = [0, 0], sizes = [4, 32], strides = [1, 1]} : vector<4x96xf32> to vector<4x32xf32>
    %18 = vector.extract_strided_slice %14 {offsets = [0, 32], sizes = [4, 32], strides = [1, 1]} : vector<4x96xf32> to vector<4x32xf32>
    %19 = vector.extract_strided_slice %14 {offsets = [0, 64], sizes = [4, 32], strides = [1, 1]} : vector<4x96xf32> to vector<4x32xf32>
    %20 = arith.mulf %18, %5 : vector<4x32xf32>
    %21 = arith.mulf %17, %16 : vector<4x32xf32>
    %22 = arith.addf %20, %21 : vector<4x32xf32>
    %23 = math.tanh %22 : vector<4x32xf32>
    %24 = arith.mulf %19, %23 : vector<4x32xf32>
    %c0_9 = arith.constant 0 : index
    %c0_10 = arith.constant 0 : index
    %25 = vector.load %arg4[%c0_9, %c0_10] : memref<4x256xf32, #tpu.memory_space<vmem>>, vector<4x32xf32>
    tpu.vector_store %arg4[%c0_9, %c0_10], %24 {strides = array<i32>} : memref<4x256xf32, #tpu.memory_space<vmem>>, vector<4x32xf32>,
    %c0_11 = arith.constant 0 : index
    %c128 = arith.constant 128 : index
    %26 = vector.load %arg2[%c0_11, %c128] : memref<4x1024xf32, #tpu.memory_space<vmem>>, vector<4x128xf32>
    %cst_12 = arith.constant dense<0.000000e+00> : vector<4x128xf32>
    %27 = tpu.matmul %24, %3, %cst_12 {dimension_numbers = #tpu.dot_dimension_numbers<[1], [0], [0], [1], [0, 0, 1, 1], [], []>} : vector<4x32xf32>, vector<32x128xf32>, vector<4x128xf32> -> vector<4x128xf32>
    %28 = arith.addf %27, %26 : vector<4x128xf32>
    %29 = vector.extract_strided_slice %28 {offsets = [0, 0], sizes = [4, 96], strides = [1, 1]} : vector<4x128xf32> to vector<4x96xf32>
    %30 = arith.negf %29 : vector<4x96xf32>
    %31 = math.exp %30 : vector<4x96xf32>
    %cst_13 = arith.constant 1.000000e+00 : f32
    %32 = vector.broadcast %cst_13 : f32 to vector<4x96xf32>
    %33 = arith.addf %32, %31 : vector<4x96xf32>
    %34 = arith.divf %32, %33 : vector<4x96xf32>
    %35 = vector.extract_strided_slice %28 {offsets = [0, 96], sizes = [4, 32], strides = [1, 1]} : vector<4x128xf32> to vector<4x32xf32>
    %36 = math.tanh %35 : vector<4x32xf32>
    %37 = vector.extract_strided_slice %34 {offsets = [0, 0], sizes = [4, 32], strides = [1, 1]} : vector<4x96xf32> to vector<4x32xf32>
    %38 = vector.extract_strided_slice %34 {offsets = [0, 32], sizes = [4, 32], strides = [1, 1]} : vector<4x96xf32> to vector<4x32xf32>
    %39 = vector.extract_strided_slice %34 {offsets = [0, 64], sizes = [4, 32], strides = [1, 1]} : vector<4x96xf32> to vector<4x32xf32>
    %40 = arith.mulf %38, %22 : vector<4x32xf32>
    %41 = arith.mulf %37, %36 : vector<4x32xf32>
    %42 = arith.addf %40, %41 : vector<4x32xf32>
    %43 = math.tanh %42 : vector<4x32xf32>
    %44 = arith.mulf %39, %43 : vector<4x32xf32>
    %c0_14 = arith.constant 0 : index
    %c32 = arith.constant 32 : index
    %45 = vector.load %arg4[%c0_14, %c32] : memref<4x256xf32, #tpu.memory_space<vmem>>, vector<4x32xf32>
    tpu.vector_store %arg4[%c0_14, %c32], %44 {strides = array<i32>} : memref<4x256xf32, #tpu.memory_space<vmem>>, vector<4x32xf32>,
    %c0_15 = arith.constant 0 : index
    %c256 = arith.constant 256 : index
    %46 = vector.load %arg2[%c0_15, %c256] : memref<4x1024xf32, #tpu.memory_space<vmem>>, vector<4x128xf32>
    %cst_16 = arith.constant dense<0.000000e+00> : vector<4x128xf32>
    %47 = tpu.matmul %44, %3, %cst_16 {dimension_numbers = #tpu.dot_dimension_numbers<[1], [0], [0], [1], [0, 0, 1, 1], [], []>} : vector<4x32xf32>, vector<32x128xf32>, vector<4x128xf32> -> vector<4x128xf32>
    %48 = arith.addf %47, %46 : vector<4x128xf32>
    %49 = vector.extract_strided_slice %48 {offsets = [0, 0], sizes = [4, 96], strides = [1, 1]} : vector<4x128xf32> to vector<4x96xf32>
    %50 = arith.negf %49 : vector<4x96xf32>
    %51 = math.exp %50 : vector<4x96xf32>
    %cst_17 = arith.constant 1.000000e+00 : f32
    %52 = vector.broadcast %cst_17 : f32 to vector<4x96xf32>
    %53 = arith.addf %52, %51 : vector<4x96xf32>
    %54 = arith.divf %52, %53 : vector<4x96xf32>
    %55 = vector.extract_strided_slice %48 {offsets = [0, 96], sizes = [4, 32], strides = [1, 1]} : vector<4x128xf32> to vector<4x32xf32>
    %56 = math.tanh %55 : vector<4x32xf32>
    %57 = vector.extract_strided_slice %54 {offsets = [0, 0], sizes = [4, 32], strides = [1, 1]} : vector<4x96xf32> to vector<4x32xf32>
    %58 = vector.extract_strided_slice %54 {offsets = [0, 32], sizes = [4, 32], strides = [1, 1]} : vector<4x96xf32> to vector<4x32xf32>
    %59 = vector.extract_strided_slice %54 {offsets = [0, 64], sizes = [4, 32], strides = [1, 1]} : vector<4x96xf32> to vector<4x32xf32>
    %60 = arith.mulf %58, %42 : vector<4x32xf32>
    %61 = arith.mulf %57, %56 : vector<4x32xf32>
    %62 = arith.addf %60, %61 : vector<4x32xf32>
    %63 = math.tanh %62 : vector<4x32xf32>
    %64 = arith.mulf %59, %63 : vector<4x32xf32>
    %c0_18 = arith.constant 0 : index
    %c64 = arith.constant 64 : index
    %65 = vector.load %arg4[%c0_18, %c64] : memref<4x256xf32, #tpu.memory_space<vmem>>, vector<4x32xf32>
    tpu.vector_store %arg4[%c0_18, %c64], %64 {strides = array<i32>} : memref<4x256xf32, #tpu.memory_space<vmem>>, vector<4x32xf32>,
    %c0_19 = arith.constant 0 : index
    %c384 = arith.constant 384 : index
    %66 = vector.load %arg2[%c0_19, %c384] : memref<4x1024xf32, #tpu.memory_space<vmem>>, vector<4x128xf32>
    %cst_20 = arith.constant dense<0.000000e+00> : vector<4x128xf32>
    %67 = tpu.matmul %64, %3, %cst_20 {dimension_numbers = #tpu.dot_dimension_numbers<[1], [0], [0], [1], [0, 0, 1, 1], [], []>} : vector<4x32xf32>, vector<32x128xf32>, vector<4x128xf32> -> vector<4x128xf32>
    %68 = arith.addf %67, %66 : vector<4x128xf32>
    %69 = vector.extract_strided_slice %68 {offsets = [0, 0], sizes = [4, 96], strides = [1, 1]} : vector<4x128xf32> to vector<4x96xf32>
    %70 = arith.negf %69 : vector<4x96xf32>
    %71 = math.exp %70 : vector<4x96xf32>
    %cst_21 = arith.constant 1.000000e+00 : f32
    %72 = vector.broadcast %cst_21 : f32 to vector<4x96xf32>
    %73 = arith.addf %72, %71 : vector<4x96xf32>
    %74 = arith.divf %72, %73 : vector<4x96xf32>
    %75 = vector.extract_strided_slice %68 {offsets = [0, 96], sizes = [4, 32], strides = [1, 1]} : vector<4x128xf32> to vector<4x32xf32>
    %76 = math.tanh %75 : vector<4x32xf32>
    %77 = vector.extract_strided_slice %74 {offsets = [0, 0], sizes = [4, 32], strides = [1, 1]} : vector<4x96xf32> to vector<4x32xf32>
    %78 = vector.extract_strided_slice %74 {offsets = [0, 32], sizes = [4, 32], strides = [1, 1]} : vector<4x96xf32> to vector<4x32xf32>
    %79 = vector.extract_strided_slice %74 {offsets = [0, 64], sizes = [4, 32], strides = [1, 1]} : vector<4x96xf32> to vector<4x32xf32>
    %80 = arith.mulf %78, %62 : vector<4x32xf32>
    %81 = arith.mulf %77, %76 : vector<4x32xf32>
    %82 = arith.addf %80, %81 : vector<4x32xf32>
    %83 = math.tanh %82 : vector<4x32xf32>
    %84 = arith.mulf %79, %83 : vector<4x32xf32>
    %c0_22 = arith.constant 0 : index
    %c96 = arith.constant 96 : index
    %85 = vector.load %arg4[%c0_22, %c96] : memref<4x256xf32, #tpu.memory_space<vmem>>, vector<4x32xf32>
    tpu.vector_store %arg4[%c0_22, %c96], %84 {strides = array<i32>} : memref<4x256xf32, #tpu.memory_space<vmem>>, vector<4x32xf32>,
    %c0_23 = arith.constant 0 : index
    %c512 = arith.constant 512 : index
    %86 = vector.load %arg2[%c0_23, %c512] : memref<4x1024xf32, #tpu.memory_space<vmem>>, vector<4x128xf32>
    %cst_24 = arith.constant dense<0.000000e+00> : vector<4x128xf32>
    %87 = tpu.matmul %84, %3, %cst_24 {dimension_numbers = #tpu.dot_dimension_numbers<[1], [0], [0], [1], [0, 0, 1, 1], [], []>} : vector<4x32xf32>, vector<32x128xf32>, vector<4x128xf32> -> vector<4x128xf32>
    %88 = arith.addf %87, %86 : vector<4x128xf32>
    %89 = vector.extract_strided_slice %88 {offsets = [0, 0], sizes = [4, 96], strides = [1, 1]} : vector<4x128xf32> to vector<4x96xf32>
    %90 = arith.negf %89 : vector<4x96xf32>
    %91 = math.exp %90 : vector<4x96xf32>
    %cst_25 = arith.constant 1.000000e+00 : f32
    %92 = vector.broadcast %cst_25 : f32 to vector<4x96xf32>
    %93 = arith.addf %92, %91 : vector<4x96xf32>
    %94 = arith.divf %92, %93 : vector<4x96xf32>
    %95 = vector.extract_strided_slice %88 {offsets = [0, 96], sizes = [4, 32], strides = [1, 1]} : vector<4x128xf32> to vector<4x32xf32>
    %96 = math.tanh %95 : vector<4x32xf32>
    %97 = vector.extract_strided_slice %94 {offsets = [0, 0], sizes = [4, 32], strides = [1, 1]} : vector<4x96xf32> to vector<4x32xf32>
    %98 = vector.extract_strided_slice %94 {offsets = [0, 32], sizes = [4, 32], strides = [1, 1]} : vector<4x96xf32> to vector<4x32xf32>
    %99 = vector.extract_strided_slice %94 {offsets = [0, 64], sizes = [4, 32], strides = [1, 1]} : vector<4x96xf32> to vector<4x32xf32>
    %100 = arith.mulf %98, %82 : vector<4x32xf32>
    %101 = arith.mulf %97, %96 : vector<4x32xf32>
    %102 = arith.addf %100, %101 : vector<4x32xf32>
    %103 = math.tanh %102 : vector<4x32xf32>
    %104 = arith.mulf %99, %103 : vector<4x32xf32>
    %c0_26 = arith.constant 0 : index
    %c128_27 = arith.constant 128 : index
    %105 = vector.load %arg4[%c0_26, %c128_27] : memref<4x256xf32, #tpu.memory_space<vmem>>, vector<4x32xf32>
    tpu.vector_store %arg4[%c0_26, %c128_27], %104 {strides = array<i32>} : memref<4x256xf32, #tpu.memory_space<vmem>>, vector<4x32xf32>,
    %c0_28 = arith.constant 0 : index
    %c640 = arith.constant 640 : index
    %106 = vector.load %arg2[%c0_28, %c640] : memref<4x1024xf32, #tpu.memory_space<vmem>>, vector<4x128xf32>
    %cst_29 = arith.constant dense<0.000000e+00> : vector<4x128xf32>
    %107 = tpu.matmul %104, %3, %cst_29 {dimension_numbers = #tpu.dot_dimension_numbers<[1], [0], [0], [1], [0, 0, 1, 1], [], []>} : vector<4x32xf32>, vector<32x128xf32>, vector<4x128xf32> -> vector<4x128xf32>
    %108 = arith.addf %107, %106 : vector<4x128xf32>
    %109 = vector.extract_strided_slice %108 {offsets = [0, 0], sizes = [4, 96], strides = [1, 1]} : vector<4x128xf32> to vector<4x96xf32>
    %110 = arith.negf %109 : vector<4x96xf32>
    %111 = math.exp %110 : vector<4x96xf32>
    %cst_30 = arith.constant 1.000000e+00 : f32
    %112 = vector.broadcast %cst_30 : f32 to vector<4x96xf32>
    %113 = arith.addf %112, %111 : vector<4x96xf32>
    %114 = arith.divf %112, %113 : vector<4x96xf32>
    %115 = vector.extract_strided_slice %108 {offsets = [0, 96], sizes = [4, 32], strides = [1, 1]} : vector<4x128xf32> to vector<4x32xf32>
    %116 = math.tanh %115 : vector<4x32xf32>
    %117 = vector.extract_strided_slice %114 {offsets = [0, 0], sizes = [4, 32], strides = [1, 1]} : vector<4x96xf32> to vector<4x32xf32>
    %118 = vector.extract_strided_slice %114 {offsets = [0, 32], sizes = [4, 32], strides = [1, 1]} : vector<4x96xf32> to vector<4x32xf32>
    %119 = vector.extract_strided_slice %114 {offsets = [0, 64], sizes = [4, 32], strides = [1, 1]} : vector<4x96xf32> to vector<4x32xf32>
    %120 = arith.mulf %118, %102 : vector<4x32xf32>
    %121 = arith.mulf %117, %116 : vector<4x32xf32>
    %122 = arith.addf %120, %121 : vector<4x32xf32>
    %123 = math.tanh %122 : vector<4x32xf32>
    %124 = arith.mulf %119, %123 : vector<4x32xf32>
    %c0_31 = arith.constant 0 : index
    %c160 = arith.constant 160 : index
    %125 = vector.load %arg4[%c0_31, %c160] : memref<4x256xf32, #tpu.memory_space<vmem>>, vector<4x32xf32>
    tpu.vector_store %arg4[%c0_31, %c160], %124 {strides = array<i32>} : memref<4x256xf32, #tpu.memory_space<vmem>>, vector<4x32xf32>,
    %c0_32 = arith.constant 0 : index
    %c768 = arith.constant 768 : index
    %126 = vector.load %arg2[%c0_32, %c768] : memref<4x1024xf32, #tpu.memory_space<vmem>>, vector<4x128xf32>
    %cst_33 = arith.constant dense<0.000000e+00> : vector<4x128xf32>
    %127 = tpu.matmul %124, %3, %cst_33 {dimension_numbers = #tpu.dot_dimension_numbers<[1], [0], [0], [1], [0, 0, 1, 1], [], []>} : vector<4x32xf32>, vector<32x128xf32>, vector<4x128xf32> -> vector<4x128xf32>
    %128 = arith.addf %127, %126 : vector<4x128xf32>
    %129 = vector.extract_strided_slice %128 {offsets = [0, 0], sizes = [4, 96], strides = [1, 1]} : vector<4x128xf32> to vector<4x96xf32>
    %130 = arith.negf %129 : vector<4x96xf32>
    %131 = math.exp %130 : vector<4x96xf32>
    %cst_34 = arith.constant 1.000000e+00 : f32
    %132 = vector.broadcast %cst_34 : f32 to vector<4x96xf32>
    %133 = arith.addf %132, %131 : vector<4x96xf32>
    %134 = arith.divf %132, %133 : vector<4x96xf32>
    %135 = vector.extract_strided_slice %128 {offsets = [0, 96], sizes = [4, 32], strides = [1, 1]} : vector<4x128xf32> to vector<4x32xf32>
    %136 = math.tanh %135 : vector<4x32xf32>
    %137 = vector.extract_strided_slice %134 {offsets = [0, 0], sizes = [4, 32], strides = [1, 1]} : vector<4x96xf32> to vector<4x32xf32>
    %138 = vector.extract_strided_slice %134 {offsets = [0, 32], sizes = [4, 32], strides = [1, 1]} : vector<4x96xf32> to vector<4x32xf32>
    %139 = vector.extract_strided_slice %134 {offsets = [0, 64], sizes = [4, 32], strides = [1, 1]} : vector<4x96xf32> to vector<4x32xf32>
    %140 = arith.mulf %138, %122 : vector<4x32xf32>
    %141 = arith.mulf %137, %136 : vector<4x32xf32>
    %142 = arith.addf %140, %141 : vector<4x32xf32>
    %143 = math.tanh %142 : vector<4x32xf32>
    %144 = arith.mulf %139, %143 : vector<4x32xf32>
    %c0_35 = arith.constant 0 : index
    %c192 = arith.constant 192 : index
    %145 = vector.load %arg4[%c0_35, %c192] : memref<4x256xf32, #tpu.memory_space<vmem>>, vector<4x32xf32>
    tpu.vector_store %arg4[%c0_35, %c192], %144 {strides = array<i32>} : memref<4x256xf32, #tpu.memory_space<vmem>>, vector<4x32xf32>,
    %c0_36 = arith.constant 0 : index
    %c896 = arith.constant 896 : index
    %146 = vector.load %arg2[%c0_36, %c896] : memref<4x1024xf32, #tpu.memory_space<vmem>>, vector<4x128xf32>
    %cst_37 = arith.constant dense<0.000000e+00> : vector<4x128xf32>
    %147 = tpu.matmul %144, %3, %cst_37 {dimension_numbers = #tpu.dot_dimension_numbers<[1], [0], [0], [1], [0, 0, 1, 1], [], []>} : vector<4x32xf32>, vector<32x128xf32>, vector<4x128xf32> -> vector<4x128xf32>
    %148 = arith.addf %147, %146 : vector<4x128xf32>
    %149 = vector.extract_strided_slice %148 {offsets = [0, 0], sizes = [4, 96], strides = [1, 1]} : vector<4x128xf32> to vector<4x96xf32>
    %150 = arith.negf %149 : vector<4x96xf32>
    %151 = math.exp %150 : vector<4x96xf32>
    %cst_38 = arith.constant 1.000000e+00 : f32
    %152 = vector.broadcast %cst_38 : f32 to vector<4x96xf32>
    %153 = arith.addf %152, %151 : vector<4x96xf32>
    %154 = arith.divf %152, %153 : vector<4x96xf32>
    %155 = vector.extract_strided_slice %148 {offsets = [0, 96], sizes = [4, 32], strides = [1, 1]} : vector<4x128xf32> to vector<4x32xf32>
    %156 = math.tanh %155 : vector<4x32xf32>
    %157 = vector.extract_strided_slice %154 {offsets = [0, 0], sizes = [4, 32], strides = [1, 1]} : vector<4x96xf32> to vector<4x32xf32>
    %158 = vector.extract_strided_slice %154 {offsets = [0, 32], sizes = [4, 32], strides = [1, 1]} : vector<4x96xf32> to vector<4x32xf32>
    %159 = vector.extract_strided_slice %154 {offsets = [0, 64], sizes = [4, 32], strides = [1, 1]} : vector<4x96xf32> to vector<4x32xf32>
    %160 = arith.mulf %158, %142 : vector<4x32xf32>
    %161 = arith.mulf %157, %156 : vector<4x32xf32>
    %162 = arith.addf %160, %161 : vector<4x32xf32>
    %163 = math.tanh %162 : vector<4x32xf32>
    %164 = arith.mulf %159, %163 : vector<4x32xf32>
    %c0_39 = arith.constant 0 : index
    %c224 = arith.constant 224 : index
    %165 = vector.load %arg4[%c0_39, %c224] : memref<4x256xf32, #tpu.memory_space<vmem>>, vector<4x32xf32>
    tpu.vector_store %arg4[%c0_39, %c224], %164 {strides = array<i32>} : memref<4x256xf32, #tpu.memory_space<vmem>>, vector<4x32xf32>,
    %c0_40 = arith.constant 0 : index
    %c0_41 = arith.constant 0 : index
    %166 = vector.load %arg6[%c0_40, %c0_41] : memref<4x32xf32, #tpu.memory_space<vmem>>, vector<4x32xf32>
    tpu.vector_store %arg6[%c0_40, %c0_41], %164 {strides = array<i32>} : memref<4x32xf32, #tpu.memory_space<vmem>>, vector<4x32xf32>,
    %c0_42 = arith.constant 0 : index
    %c0_43 = arith.constant 0 : index
    %167 = vector.load %arg7[%c0_42, %c0_43] : memref<4x32xf32, #tpu.memory_space<vmem>>, vector<4x32xf32>
    tpu.vector_store %arg7[%c0_42, %c0_43], %162 {strides = array<i32>} : memref<4x32xf32, #tpu.memory_space<vmem>>, vector<4x32xf32>,
    %c0_i32_44 = arith.constant 0 : i32
    %168 = arith.cmpi eq, %arg1, %c0_i32_44 : i32
    %169 = arith.extui %168 : i1 to i32
    %c0_i32_45 = arith.constant 0 : i32
    %170 = arith.cmpi ne, %169, %c0_i32_45 : i32
    scf.if %170 {
      %c0_46 = arith.constant 0 : index
      %c0_47 = arith.constant 0 : index
      %171 = vector.load %arg7[%c0_46, %c0_47] : memref<4x32xf32, #tpu.memory_space<vmem>>, vector<4x32xf32>
      %c0_48 = arith.constant 0 : index
      %c0_49 = arith.constant 0 : index
      %172 = vector.load %arg5[%c0_48, %c0_49] : memref<4x32xf32, #tpu.memory_space<vmem>>, vector<4x32xf32>
      tpu.vector_store %arg5[%c0_48, %c0_49], %171 {strides = array<i32>} : memref<4x32xf32, #tpu.memory_space<vmem>>, vector<4x32xf32>,
    } else {
    }
    return
  }
  func.func @transform_0(%arg0: i32, %arg1: i32) -> (i32, i32) {
    %c0_i32 = arith.constant 0 : i32
    return %arg0, %arg1 : i32, i32
  }
  func.func @transform_1(%arg0: i32, %arg1: i32) -> (i32, i32) {
    %c0_i32 = arith.constant 0 : i32
    %c0_i32_0 = arith.constant 0 : i32
    %c0_i32_1 = arith.constant 0 : i32
    return %c0_i32, %c0_i32_0 : i32, i32
  }
  func.func @transform_2(%arg0: i32, %arg1: i32) -> (i32, i32) {
    %c0_i32 = arith.constant 0 : i32
    return %arg0, %arg1 : i32, i32
  }
  func.func @transform_3(%arg0: i32, %arg1: i32) -> (i32, i32) {
    %c0_i32 = arith.constant 0 : i32
    %c0_i32_0 = arith.constant 0 : i32
    return %arg0, %c0_i32 : i32, i32
  }
}

</mosaic_0001>

<bundles_post_ra>
// kernel: lstm_pallas.1
= control target key start
LH: loop header
LB: loop body
LE: loop exit
PB: predicated region body
PF: predicated region fallthrough
CT: control target
= control target key end

     0   :  { %vm18_vm0 = vcmask 257024   ;;  %v706_v2 = vmov 0.0   ;;  %s870_s0 = inlined_call_operand.vmem [shape: f32[4,1024], index: 0, kind: input, shape index: {}]   ;;  %s871_s1 = inlined_call_operand.vmem [shape: f32[32,128], index: 1, kind: input, shape index: {}]   ;;  %s872_s2 = inlined_call_operand.vmem [shape: f32[4,256], index: 2, kind: output, shape index: {0}]   ;;  %s873_s3 = inlined_call_operand.hbm [shape: f32[4,32], index: 3, kind: output, shape index: {1}]  }
   0x1   :  { %v24_v0 = vld [vmem:[%s871_s1 + $0x18] sm:$0xff]  ;;  %v23_v1 = vld [vmem:[%s871_s1 + $0x10] sm:$0xff]  ;;  %19 = vst.msk [vmem:[#allocation2] sm:$0xf] %vm18_vm0, %v706_v2  ;;  %v22_v3 = vld [vmem:[%s871_s1 + $0x8] sm:$0xff] }
   0x2   :  { %44 = vmatpush.msra.mxu0 %v24_v0  ;;  %114 = vmatpush.msra.mxu1 %v24_v0  ;;  %20 = vst.msk [vmem:[#allocation3] sm:$0xf] %vm18_vm0, %v706_v2 }
   0x3   :  { %182 = vmatpush.msra.mxu2 %v24_v0  ;;  %247 = vmatpush.msra.mxu3 %v24_v0 }
   0x4   :  { %9 = vsyncpa [#allocation5], 0  ;;  %45 = vmatpush.msra.mxu0 %v23_v1  ;;  %115 = vmatpush.msra.mxu1 %v23_v1  ;;  %v21_v4 = vld [vmem:[%s871_s1] sm:$0xff]  ;;  %vm28_vm1 = vcmask 261120   ;;  %s707_s21 = smov 32   ;;  %s708_s22 = smov 64  }
   0x5   :  { %183 = vmatpush.msra.mxu2 %v23_v1  ;;  %248 = vmatpush.msra.mxu3 %v23_v1  ;;  %v27_v6 = vld [vmem:[%s870_s0] sm:$0xf]  ;;  %v99_v34 = vld [vmem:[%s870_s0 + $0x4] sm:$0xf]  ;;  %v165_v60 = vld [vmem:[%s870_s0 + $0x8] sm:$0xf] }
   0x6   :  { %46 = vmatpush.msra.mxu0 %v22_v3  ;;  %116 = vmatpush.msra.mxu1 %v22_v3  ;;  %s710_s1 = smov [#allocation4]   ;;  %s584_s25 = sshll.u32 %s873_s3, 4  ;;  %s585_s25 = int_to_ptr.hbm [resolvable:$true] %s584_s25 }
   0x7   :  { %184 = vmatpush.msra.mxu2 %v22_v3  ;;  %249 = vmatpush.msra.mxu3 %v22_v3  ;;  %s582_s20 = sshll.u32 %s710_s1, 4  ;;  %s583_s20 = int_to_ptr.vmem [resolvable:$true] %s582_s20 }
   0x8   :  { %47 = vmatpush.msra.mxu0 %v21_v4  ;;  %117 = vmatpush.msra.mxu1 %v21_v4  ;;  %v25_v5 = vld [vmem:[#allocation2] sm:$0xf] }
   0x9   :  { %185 = vmatpush.msra.mxu2 %v21_v4  ;;  %250 = vmatpush.msra.mxu3 %v21_v4  ;;  %v26_v10 = vld [vmem:[#allocation3] sm:$0xf] }
   0xa   :  { %595 = vmatmul.msk.f32.vlgmr.msra.gmra.mxu0 %vm28_vm1, %v25_v5  ;;  %380 = vmatpush.msrb.mxu1 %v24_v0 }
   0xb   :  { %315 = vmatpush.msrb.mxu0 %v24_v0  ;;  %447 = vmatpush.msrb.mxu2 %v24_v0 }
   0xc   :  { %381 = vmatpush.msrb.mxu1 %v23_v1  ;;  %511 = vmatpush.msrb.mxu3 %v24_v0 }
   0xd   :  { %316 = vmatpush.msrb.mxu0 %v23_v1  ;;  %448 = vmatpush.msrb.mxu2 %v23_v1 }
   0xe   :  { %382 = vmatpush.msrb.mxu1 %v22_v3  ;;  %512 = vmatpush.msrb.mxu3 %v23_v1 }
   0xf   :  { %317 = vmatpush.msrb.mxu0 %v22_v3  ;;  %449 = vmatpush.msrb.mxu2 %v22_v3 }
  0x10   :  { %383 = vmatpush.msrb.mxu1 %v21_v4  ;;  %513 = vmatpush.msrb.mxu3 %v22_v3 }
  0x11   :  { %318 = vmatpush.msrb.mxu0 %v21_v4  ;;  %450 = vmatpush.msrb.mxu2 %v21_v4 }
  0x12   :  { %514 = vmatpush.msrb.mxu3 %v21_v4 }
  0x87   :  { %v49_v7 = vpop.f32.mrf.mxu0 }
  0x88   :  { %v50_v8 = vadd.f32 %v49_v7, %v27_v6 }
  0x8a   :  { %616 = vtanh.f32 %v50_v8  ;;  %v596_v11 = vmul.f32 -1.442695, %v50_v8 }
  0x8c   :  { %618 = vpow2.f32 %v596_v11 }
  0x90   :  { %v617_v9 = vpop.eup %616 }
  0x91   :  { %78 = vrot.lane.b32.xlu0 %v617_v9, %s707_s21 }
  0x92   :  { %v619_v12 = vpop.eup %618 }
  0x93   :  { %v55_v13 = vadd.f32 1.0, %v619_v12 }
  0x95   :  { %620 = vrcp.f32 %v55_v13  ;;  %v67_v19 = vand.u32 2147483648, %v55_v13  ;;  %vm61_vm3 = vweird.f32 %v55_v13  ;;  %v65_v20 = vand.u32 2147483647, %v55_v13 }
  0x97   :  { %v68_v22 = vor.u32 1.1754944e-38, %v67_v19  ;;  %vm66_vm5 = vcmp.eq.f32.partialorder %v65_v20, 8.507059e+37 }
  0x99   :  { %73 = vrot.lane.b32.xlu0 %v26_v10, %s707_s21 }
  0x9b   :  { %v621_v14 = vpop.eup %620 }
  0x9c   :  { %v57_v15 = vmul.f32 %v621_v14, %v55_v13  ;;  %vm62_vm2 = vweird.f32 %v621_v14 }
  0x9d   :  { %vm63_vm4 = vmor %vm61_vm3, %vm62_vm2 }
  0x9e   :  { %v58_v16 = vsub.f32 1.0, %v57_v15 }
  0xa0   :  { %v59_v17 = vmul.f32 %v621_v14, %v58_v16 }
  0xa2   :  { %v60_v18 = vadd.f32 %v621_v14, %v59_v17 }
  0xa4   :  { %v64_v21 = vsel %vm63_vm4, %v621_v14, %v60_v18 }
  0xa5   :  { %v69_v24 = vsel %vm66_vm5, %v68_v22, %v64_v21  ;;  %v229_v22 = vld [vmem:[%s870_s0 + $0xc] sm:$0xf] }
 0x103   :  { %v79_v23 = vpop.permute.xlu0 %78 }
 0x104   :  { %v81_v25 = vmul.f32 %v79_v23, %v69_v24 }
 0x106   :  { %83 = vrot.lane.b32.xlu1 %v81_v25, %s707_s21 }
 0x10b   :  { %v74_v26 = vpop.permute.xlu0 %73 }
 0x10c   :  { %v76_v27 = vmul.f32 %v74_v26, %v69_v24 }
 0x178   :  { %v84_v28 = vpop.permute.xlu1 %83 }
 0x179   :  { %v86_v29 = vadd.f32 %v84_v28, %v76_v27 }
 0x17b   :  { %622 = vtanh.f32 %v86_v29 }
 0x181   :  { %v623_v30 = vpop.eup %622 }
 0x182   :  { %89 = vrot.lane.b32.xlu1 %v623_v30, %s707_s21 }
 0x1f4   :  { %v90_v31 = vpop.permute.xlu1 %89 }
 0x1f5   :  { %v92_v32 = vmul.f32 %v90_v31, %v69_v24 }
 0x1f7   :  { %94 = vrot.lane.b32.xlu2 %v92_v32, %s708_s22 }
 0x251   :  { %v95_v33 = vpop.permute.xlu2 %94 }
 0x252   :  { %98 = vst.msk [vmem:[%s872_s2] sm:$0xf] %vm18_vm0, %v95_v33  ;;  %597 = vmatmul.msk.f32.vlgmr.msra.gmra.mxu1 %vm28_vm1, %v95_v33 }
 0x2cf   :  { %v119_v35 = vpop.f32.mrf.mxu1 }
 0x2d0   :  { %v120_v36 = vadd.f32 %v119_v35, %v99_v34 }
 0x2d2   :  { %624 = vtanh.f32 %v120_v36  ;;  %v598_v38 = vmul.f32 -1.442695, %v120_v36 }
 0x2d4   :  { %626 = vpow2.f32 %v598_v38 }
 0x2d8   :  { %v625_v37 = vpop.eup %624 }
 0x2d9   :  { %144 = vrot.lane.b32.xlu2 %v625_v37, %s707_s21 }
 0x2da   :  { %v627_v39 = vpop.eup %626 }
 0x2db   :  { %v125_v40 = vadd.f32 1.0, %v627_v39 }
 0x2dd   :  { %628 = vrcp.f32 %v125_v40  ;;  %v137_v46 = vand.u32 2147483648, %v125_v40  ;;  %vm131_vm7 = vweird.f32 %v125_v40  ;;  %v135_v47 = vand.u32 2147483647, %v125_v40 }
 0x2df   :  { %v138_v49 = vor.u32 1.1754944e-38, %v137_v46  ;;  %vm136_vm9 = vcmp.eq.f32.partialorder %v135_v47, 8.507059e+37 }
 0x2e3   :  { %v629_v41 = vpop.eup %628 }
 0x2e4   :  { %v127_v42 = vmul.f32 %v629_v41, %v125_v40  ;;  %vm132_vm6 = vweird.f32 %v629_v41 }
 0x2e5   :  { %vm133_vm8 = vmor %vm131_vm7, %vm132_vm6 }
 0x2e6   :  { %v128_v43 = vsub.f32 1.0, %v127_v42 }
 0x2e8   :  { %v129_v44 = vmul.f32 %v629_v41, %v128_v43 }
 0x2ea   :  { %v130_v45 = vadd.f32 %v629_v41, %v129_v44 }
 0x2ec   :  { %v134_v48 = vsel %vm133_vm8, %v629_v41, %v130_v45 }
 0x2ed   :  { %v139_v51 = vsel %vm136_vm9, %v138_v49, %v134_v48  ;;  %v298_v48 = vld [vmem:[%s870_s0 + $0x10] sm:$0xf] }
 0x2ee   :  { %v142_v53 = vmul.f32 %v139_v51, %v86_v29 }
 0x333   :  { %v145_v50 = vpop.permute.xlu2 %144 }
 0x334   :  { %v147_v52 = vmul.f32 %v145_v50, %v139_v51 }
 0x336   :  { %149 = vrot.lane.b32.xlu0 %v147_v52, %s707_s21 }
 0x3a8   :  { %v150_v54 = vpop.permute.xlu0 %149 }
 0x3a9   :  { %v152_v55 = vadd.f32 %v150_v54, %v142_v53 }
 0x3ab   :  { %630 = vtanh.f32 %v152_v55 }
 0x3b1   :  { %v631_v56 = vpop.eup %630 }
 0x3b2   :  { %155 = vrot.lane.b32.xlu1 %v631_v56, %s707_s21 }
 0x424   :  { %v156_v57 = vpop.permute.xlu1 %155 }
 0x425   :  { %v765_v58 = vmul.f32 %v156_v57, %v139_v51 }
 0x427   :  { %166 = vrot.lane.b32.xlu2 %v765_v58, %s708_s22 }
 0x481   :  { %v167_v59 = vpop.permute.xlu2 %166 }
 0x482   :  { %599 = vmatmul.msk.f32.vlgmr.msra.gmra.mxu2 %vm28_vm1, %v167_v59 }
 0x505   :  { %v187_v61 = vpop.f32.mrf.mxu2 }
 0x506   :  { %v188_v62 = vadd.f32 %v187_v61, %v165_v60 }
 0x508   :  { %632 = vtanh.f32 %v188_v62  ;;  %v600_v0 = vmul.f32 -1.442695, %v188_v62 }
 0x50a   :  { %634 = vpow2.f32 %v600_v0 }
 0x50e   :  { %v633_v63 = vpop.eup %632 }
 0x50f   :  { %212 = vrot.lane.b32.xlu0 %v633_v63, %s707_s21 }
 0x510   :  { %v635_v1 = vpop.eup %634 }
 0x511   :  { %v193_v2 = vadd.f32 1.0, %v635_v1 }
 0x513   :  { %636 = vrcp.f32 %v193_v2  ;;  %v205_v8 = vand.u32 2147483648, %v193_v2  ;;  %vm199_vm11 = vweird.f32 %v193_v2  ;;  %v203_v9 = vand.u32 2147483647, %v193_v2 }
 0x515   :  { %v206_v11 = vor.u32 1.1754944e-38, %v205_v8  ;;  %vm204_vm13 = vcmp.eq.f32.partialorder %v203_v9, 8.507059e+37 }
 0x519   :  { %v637_v3 = vpop.eup %636 }
 0x51a   :  { %v195_v4 = vmul.f32 %v637_v3, %v193_v2  ;;  %vm200_vm10 = vweird.f32 %v637_v3 }
 0x51b   :  { %vm201_vm12 = vmor %vm199_vm11, %vm200_vm10 }
 0x51c   :  { %v196_v5 = vsub.f32 1.0, %v195_v4 }
 0x51e   :  { %v197_v6 = vmul.f32 %v637_v3, %v196_v5 }
 0x520   :  { %v198_v7 = vadd.f32 %v637_v3, %v197_v6 }
 0x522   :  { %v202_v10 = vsel %vm201_vm12, %v637_v3, %v198_v7 }
 0x523   :  { %v207_v13 = vsel %vm204_vm13, %v206_v11, %v202_v10  ;;  %v365_v11 = vld [vmem:[%s870_s0 + $0x14] sm:$0xf] }
 0x524   :  { %v210_v15 = vmul.f32 %v207_v13, %v152_v55 }
 0x581   :  { %v213_v12 = vpop.permute.xlu0 %212 }
 0x582   :  { %v215_v14 = vmul.f32 %v213_v12, %v207_v13 }
 0x584   :  { %217 = vrot.lane.b32.xlu1 %v215_v14, %s707_s21 }
 0x5f6   :  { %v218_v16 = vpop.permute.xlu1 %217 }
 0x5f7   :  { %v220_v17 = vadd.f32 %v218_v16, %v210_v15 }
 0x5f9   :  { %638 = vtanh.f32 %v220_v17 }
 0x5ff   :  { %v639_v18 = vpop.eup %638 }
 0x600   :  { %223 = vrot.lane.b32.xlu2 %v639_v18, %s707_s21 }
 0x65a   :  { %v224_v19 = vpop.permute.xlu2 %223 }
 0x65b   :  { %v776_v20 = vmul.f32 %v224_v19, %v207_v13 }
 0x65d   :  { %231 = vrot.lane.b32.xlu0 %v776_v20, %s708_s22 }
 0x6cf   :  { %v232_v21 = vpop.permute.xlu0 %231 }
 0x6d0   :  { %601 = vmatmul.msk.f32.vlgmr.msra.gmra.mxu3 %vm28_vm1, %v232_v21 }
 0x753   :  { %v252_v23 = vpop.f32.mrf.mxu3 }
 0x754   :  { %v253_v24 = vadd.f32 %v252_v23, %v229_v22 }
 0x756   :  { %640 = vtanh.f32 %v253_v24  ;;  %v602_v26 = vmul.f32 -1.442695, %v253_v24 }
 0x758   :  { %642 = vpow2.f32 %v602_v26 }
 0x75c   :  { %v641_v25 = vpop.eup %640 }
 0x75d   :  { %277 = vrot.lane.b32.xlu1 %v641_v25, %s707_s21 }
 0x75e   :  { %v643_v27 = vpop.eup %642 }
 0x75f   :  { %v258_v28 = vadd.f32 1.0, %v643_v27 }
 0x761   :  { %644 = vrcp.f32 %v258_v28  ;;  %v270_v34 = vand.u32 2147483648, %v258_v28  ;;  %vm264_vm15 = vweird.f32 %v258_v28  ;;  %v268_v35 = vand.u32 2147483647, %v258_v28 }
 0x763   :  { %v271_v37 = vor.u32 1.1754944e-38, %v270_v34  ;;  %vm269_vm3 = vcmp.eq.f32.partialorder %v268_v35, 8.507059e+37 }
 0x767   :  { %v645_v29 = vpop.eup %644 }
 0x768   :  { %v260_v30 = vmul.f32 %v645_v29, %v258_v28  ;;  %vm265_vm14 = vweird.f32 %v645_v29 }
 0x769   :  { %vm266_vm2 = vmor %vm264_vm15, %vm265_vm14 }
 0x76a   :  { %v261_v31 = vsub.f32 1.0, %v260_v30 }
 0x76c   :  { %v262_v32 = vmul.f32 %v645_v29, %v261_v31 }
 0x76e   :  { %v263_v33 = vadd.f32 %v645_v29, %v262_v32 }
 0x770   :  { %v267_v36 = vsel %vm266_vm2, %v645_v29, %v263_v33 }
 0x771   :  { %v272_v39 = vsel %vm269_vm3, %v271_v37, %v267_v36 }
 0x772   :  { %v275_v41 = vmul.f32 %v272_v39, %v220_v17 }
 0x7cf   :  { %v278_v38 = vpop.permute.xlu1 %277 }
 0x7d0   :  { %v280_v40 = vmul.f32 %v278_v38, %v272_v39  ;;  %v430_v38 = vld [vmem:[%s870_s0 + $0x18] sm:$0xf] }
 0x7d2   :  { %282 = vrot.lane.b32.xlu2 %v280_v40, %s707_s21 }
 0x82c   :  { %v283_v42 = vpop.permute.xlu2 %282 }
 0x82d   :  { %v285_v43 = vadd.f32 %v283_v42, %v275_v41 }
 0x82f   :  { %646 = vtanh.f32 %v285_v43 }
 0x835   :  { %v647_v44 = vpop.eup %646 }
 0x836   :  { %288 = vrot.lane.b32.xlu0 %v647_v44, %s707_s21 }
 0x8a8   :  { %v289_v45 = vpop.permute.xlu0 %288 }
 0x8a9   :  { %v787_v46 = vmul.f32 %v289_v45, %v272_v39 }
 0x8ab   :  { %299 = vrot.lane.b32.xlu1 %v787_v46, %s708_s22 }
 0x91d   :  { %v300_v47 = vpop.permute.xlu1 %299 }
 0x91e   :  { %603 = vmatmul.msk.f32.vlgmr.msrb.gmra.mxu0 %vm28_vm1, %v300_v47 }
 0x99b   :  { %v320_v49 = vpop.f32.mrf.mxu0 }
 0x99c   :  { %v321_v50 = vadd.f32 %v320_v49, %v298_v48 }
 0x99e   :  { %648 = vtanh.f32 %v321_v50  ;;  %v604_v52 = vmul.f32 -1.442695, %v321_v50 }
 0x9a0   :  { %650 = vpow2.f32 %v604_v52 }
 0x9a4   :  { %v649_v51 = vpop.eup %648 }
 0x9a5   :  { %345 = vrot.lane.b32.xlu2 %v649_v51, %s707_s21 }
 0x9a6   :  { %v651_v53 = vpop.eup %650 }
 0x9a7   :  { %v326_v54 = vadd.f32 1.0, %v651_v53 }
 0x9a9   :  { %652 = vrcp.f32 %v326_v54  ;;  %v338_v61 = vand.u32 2147483648, %v326_v54  ;;  %vm332_vm5 = vweird.f32 %v326_v54  ;;  %v336_v62 = vand.u32 2147483647, %v326_v54 }
 0x9ab   :  { %v339_v0 = vor.u32 1.1754944e-38, %v338_v61  ;;  %vm337_vm7 = vcmp.eq.f32.partialorder %v336_v62, 8.507059e+37 }
 0x9af   :  { %v653_v55 = vpop.eup %652 }
 0x9b0   :  { %v328_v56 = vmul.f32 %v653_v55, %v326_v54  ;;  %vm333_vm4 = vweird.f32 %v653_v55 }
 0x9b1   :  { %vm334_vm6 = vmor %vm332_vm5, %vm333_vm4  ;;  %vm163_vm5 = vcmask 519424  }
 0x9b2   :  { %v329_v57 = vsub.f32 1.0, %v328_v56 }
 0x9b4   :  { %v330_v59 = vmul.f32 %v653_v55, %v329_v57 }
 0x9b6   :  { %v331_v60 = vadd.f32 %v653_v55, %v330_v59 }
 0x9b8   :  { %v335_v63 = vsel %vm334_vm6, %v653_v55, %v331_v60  ;;  %vm227_vm6 = vcmask 781824  }
 0x9b9   :  { %v340_v2 = vsel %vm337_vm7, %v339_v0, %v335_v63  ;;  %vm296_vm7 = vcmask 1044224  }
 0x9ba   :  { %v343_v4 = vmul.f32 %v340_v2, %v285_v43 }
 0x9ff   :  { %v346_v1 = vpop.permute.xlu2 %345 }
 0xa00   :  { %v348_v3 = vmul.f32 %v346_v1, %v340_v2 }
 0xa02   :  { %350 = vrot.lane.b32.xlu0 %v348_v3, %s707_s21 }
 0xa74   :  { %v351_v5 = vpop.permute.xlu0 %350 }
 0xa75   :  { %v353_v6 = vadd.f32 %v351_v5, %v343_v4 }
 0xa77   :  { %654 = vtanh.f32 %v353_v6 }
 0xa7d   :  { %v655_v7 = vpop.eup %654 }
 0xa7e   :  { %356 = vrot.lane.b32.xlu1 %v655_v7, %s707_s21 }
 0xaf0   :  { %v357_v8 = vpop.permute.xlu1 %356 }
 0xaf1   :  { %v359_v9 = vmul.f32 %v357_v8, %v340_v2  ;;  %v493_v2 = vld [vmem:[%s870_s0 + $0x1c] sm:$0xf]  ;;  %s709_s0 = smov 96  }
 0xaf3   :  { %361 = vrot.lane.b32.xlu2 %v359_v9, %s708_s22 }
 0xb4d   :  { %v362_v10 = vpop.permute.xlu2 %361 }
 0xb4e   :  { %364 = vst.msk [vmem:[%s872_s2 + $0x4] sm:$0xf] %vm18_vm0, %v362_v10  ;;  %605 = vmatmul.msk.f32.vlgmr.msrb.gmra.mxu1 %vm28_vm1, %v362_v10 }
 0xbcb   :  { %v385_v12 = vpop.f32.mrf.mxu1 }
 0xbcc   :  { %v386_v13 = vadd.f32 %v385_v12, %v365_v11 }
 0xbce   :  { %656 = vtanh.f32 %v386_v13  ;;  %v606_v15 = vmul.f32 -1.442695, %v386_v13 }
 0xbd0   :  { %658 = vpow2.f32 %v606_v15 }
 0xbd4   :  { %v657_v14 = vpop.eup %656 }
 0xbd5   :  { %410 = vrot.lane.b32.xlu0 %v657_v14, %s707_s21 }
 0xbd6   :  { %v659_v16 = vpop.eup %658 }
 0xbd7   :  { %v391_v17 = vadd.f32 1.0, %v659_v16 }
 0xbd9   :  { %660 = vrcp.f32 %v391_v17  ;;  %v403_v24 = vand.u32 2147483648, %v391_v17  ;;  %vm397_vm9 = vweird.f32 %v391_v17  ;;  %v401_v25 = vand.u32 2147483647, %v391_v17 }
 0xbdb   :  { %v404_v27 = vor.u32 1.1754944e-38, %v403_v24  ;;  %vm402_vm11 = vcmp.eq.f32.partialorder %v401_v25, 8.507059e+37 }
 0xbdf   :  { %v661_v18 = vpop.eup %660 }
 0xbe0   :  { %v393_v19 = vmul.f32 %v661_v18, %v391_v17  ;;  %vm398_vm8 = vweird.f32 %v661_v18 }
 0xbe1   :  { %vm399_vm10 = vmor %vm397_vm9, %vm398_vm8 }
 0xbe2   :  { %v394_v21 = vsub.f32 1.0, %v393_v19 }
 0xbe4   :  { %v395_v22 = vmul.f32 %v661_v18, %v394_v21 }
 0xbe6   :  { %v396_v23 = vadd.f32 %v661_v18, %v395_v22 }
 0xbe8   :  { %v400_v26 = vsel %vm399_vm10, %v661_v18, %v396_v23 }
 0xbe9   :  { %v405_v29 = vsel %vm402_vm11, %v404_v27, %v400_v26 }
 0xbea   :  { %v408_v31 = vmul.f32 %v405_v29, %v353_v6 }
 0xc47   :  { %v411_v28 = vpop.permute.xlu0 %410 }
 0xc48   :  { %v413_v30 = vmul.f32 %v411_v28, %v405_v29 }
 0xc4a   :  { %415 = vrot.lane.b32.xlu1 %v413_v30, %s707_s21 }
 0xcbc   :  { %v416_v32 = vpop.permute.xlu1 %415 }
 0xcbd   :  { %v418_v33 = vadd.f32 %v416_v32, %v408_v31 }
 0xcbf   :  { %662 = vtanh.f32 %v418_v33 }
 0xcc5   :  { %v663_v34 = vpop.eup %662 }
 0xcc6   :  { %421 = vrot.lane.b32.xlu2 %v663_v34, %s707_s21 }
 0xd20   :  { %v422_v35 = vpop.permute.xlu2 %421 }
 0xd21   :  { %v810_v36 = vmul.f32 %v422_v35, %v405_v29 }
 0xd23   :  { %431 = vrot.lane.b32.xlu0 %v810_v36, %s708_s22 }
 0xd95   :  { %v432_v37 = vpop.permute.xlu0 %431 }
 0xd96   :  { %607 = vmatmul.msk.f32.vlgmr.msrb.gmra.mxu2 %vm28_vm1, %v432_v37 }
 0xe19   :  { %v452_v39 = vpop.f32.mrf.mxu2 }
 0xe1a   :  { %v453_v40 = vadd.f32 %v452_v39, %v430_v38 }
 0xe1c   :  { %664 = vtanh.f32 %v453_v40  ;;  %v608_v42 = vmul.f32 -1.442695, %v453_v40 }
 0xe1e   :  { %666 = vpow2.f32 %v608_v42 }
 0xe22   :  { %v665_v41 = vpop.eup %664 }
 0xe23   :  { %477 = vrot.lane.b32.xlu1 %v665_v41, %s707_s21 }
 0xe24   :  { %v667_v43 = vpop.eup %666 }
 0xe25   :  { %v458_v44 = vadd.f32 1.0, %v667_v43 }
 0xe27   :  { %668 = vrcp.f32 %v458_v44  ;;  %v470_v51 = vand.u32 2147483648, %v458_v44  ;;  %vm464_vm13 = vweird.f32 %v458_v44  ;;  %v468_v52 = vand.u32 2147483647, %v458_v44 }
 0xe29   :  { %v471_v54 = vor.u32 1.1754944e-38, %v470_v51  ;;  %vm469_vm15 = vcmp.eq.f32.partialorder %v468_v52, 8.507059e+37 }
 0xe2d   :  { %v669_v45 = vpop.eup %668 }
 0xe2e   :  { %v460_v47 = vmul.f32 %v669_v45, %v458_v44  ;;  %vm465_vm12 = vweird.f32 %v669_v45 }
 0xe2f   :  { %vm466_vm14 = vmor %vm464_vm13, %vm465_vm12 }
 0xe30   :  { %v461_v48 = vsub.f32 1.0, %v460_v47 }
 0xe32   :  { %v462_v49 = vmul.f32 %v669_v45, %v461_v48 }
 0xe34   :  { %v463_v50 = vadd.f32 %v669_v45, %v462_v49 }
 0xe36   :  { %v467_v53 = vsel %vm466_vm14, %v669_v45, %v463_v50 }
 0xe37   :  { %v472_v56 = vsel %vm469_vm15, %v471_v54, %v467_v53 }
 0xe38   :  { %v475_v59 = vmul.f32 %v472_v56, %v418_v33 }
 0xe95   :  { %v478_v55 = vpop.permute.xlu1 %477 }
 0xe96   :  { %v480_v57 = vmul.f32 %v478_v55, %v472_v56 }
 0xe98   :  { %482 = vrot.lane.b32.xlu2 %v480_v57, %s707_s21 }
 0xef2   :  { %v483_v60 = vpop.permute.xlu2 %482 }
 0xef3   :  { %v485_v61 = vadd.f32 %v483_v60, %v475_v59 }
 0xef5   :  { %670 = vtanh.f32 %v485_v61 }
 0xefb   :  { %v671_v62 = vpop.eup %670 }
 0xefc   :  { %488 = vrot.lane.b32.xlu0 %v671_v62, %s707_s21 }
 0xf6e   :  { %v489_v63 = vpop.permute.xlu0 %488 }
 0xf6f   :  { %v821_v0 = vmul.f32 %v489_v63, %v472_v56 }
 0xf71   :  { %495 = vrot.lane.b32.xlu1 %v821_v0, %s708_s22 }
 0xfe3   :  { %v496_v1 = vpop.permute.xlu1 %495 }
 0xfe4   :  { %609 = vmatmul.msk.f32.vlgmr.msrb.gmra.mxu3 %vm28_vm1, %v496_v1 }
0x1067   :  { %v516_v3 = vpop.f32.mrf.mxu3 }
0x1068   :  { %v517_v4 = vadd.f32 %v516_v3, %v493_v2 }
0x106a   :  { %672 = vtanh.f32 %v517_v4  ;;  %v610_v6 = vmul.f32 -1.442695, %v517_v4 }
0x106c   :  { %674 = vpow2.f32 %v610_v6 }
0x1070   :  { %v673_v5 = vpop.eup %672 }
0x1071   :  { %541 = vrot.lane.b32.xlu2 %v673_v5, %s707_s21 }
0x1072   :  { %v675_v7 = vpop.eup %674 }
0x1073   :  { %v522_v8 = vadd.f32 1.0, %v675_v7 }
0x1075   :  { %676 = vrcp.f32 %v522_v8  ;;  %v534_v14 = vand.u32 2147483648, %v522_v8  ;;  %vm528_vm2 = vweird.f32 %v522_v8  ;;  %v532_v15 = vand.u32 2147483647, %v522_v8 }
0x1077   :  { %v535_v17 = vor.u32 1.1754944e-38, %v534_v14  ;;  %vm533_vm4 = vcmp.eq.f32.partialorder %v532_v15, 8.507059e+37 }
0x107b   :  { %v677_v9 = vpop.eup %676 }
0x107c   :  { %v524_v10 = vmul.f32 %v677_v9, %v522_v8  ;;  %vm529_vm1 = vweird.f32 %v677_v9 }
0x107d   :  { %vm530_vm3 = vmor %vm528_vm2, %vm529_vm1 }
0x107e   :  { %v525_v11 = vsub.f32 1.0, %v524_v10 }
0x1080   :  { %v526_v12 = vmul.f32 %v677_v9, %v525_v11 }
0x1082   :  { %v527_v13 = vadd.f32 %v677_v9, %v526_v12 }
0x1084   :  { %v531_v16 = vsel %vm530_vm3, %v677_v9, %v527_v13 }
0x1085   :  { %v536_v19 = vsel %vm533_vm4, %v535_v17, %v531_v16 }
0x1086   :  { %v539_v22 = vmul.f32 %v536_v19, %v485_v61 }
0x10cb   :  { %v542_v18 = vpop.permute.xlu2 %541 }
0x10cc   :  { %v544_v21 = vmul.f32 %v542_v18, %v536_v19 }
0x10ce   :  { %546 = vrot.lane.b32.xlu0 %v544_v21, %s707_s21 }
0x10d6   :  { %160 = vrot.lane.b32.xlu0 %v765_v58, %s709_s0 }
0x1140   :  { %v547_v23 = vpop.permute.xlu0 %546 }
0x1141   :  { %v549_v24 = vadd.f32 %v547_v23, %v539_v22 }
0x1143   :  { %678 = vtanh.f32 %v549_v24  ;;  %566 = vrot.lane.b32.xlu2 %v549_v24, %s709_s0 }
0x1148   :  { %v161_v25 = vpop.permute.xlu0 %160 }
0x1149   :  { %v679_v26 = vpop.eup %678  ;;  %164 = vst.msk [vmem:[%s872_s2] sm:$0xf] %vm163_vm5, %v161_v25 }
0x114a   :  { %552 = vrot.lane.b32.xlu1 %v679_v26, %s707_s21  ;;  %228 = vst.msk [vmem:[%s872_s2] sm:$0xf] %vm227_vm6, %v776_v20 }
0x114b   :  { %293 = vrot.lane.b32.xlu2 %v787_v46, %s707_s21 }
0x1152   :  { %426 = vrot.lane.b32.xlu1 %v810_v36, %s709_s0 }
0x119d   :  { %v567_v58 = vpop.permute.xlu2 %566 }
0x119e   :  { %569 = vst.msk [vmem:[#allocation3] sm:$0xf] %vm18_vm0, %v567_v58 }
0x11a5   :  { %v294_v27 = vpop.permute.xlu2 %293  ;;  %v573_v28 = vld [vmem:[#allocation3] sm:$0xf] }
0x11a6   :  { %297 = vst.msk [vmem:[%s872_s2] sm:$0xf] %vm296_vm7, %v294_v27 }
0x11a7   :  { %574 = vst.msk [vmem:[#allocation4] sm:$0xf] %vm18_vm0, %v573_v28 }
0x11a8   :  { %587 = dma.vmem_to_hbm [thread:$0]  %s583_s20, 64, %s585_s25, [#allocation5]  }
0x11bc   :  { %v553_v20 = vpop.permute.xlu1 %552 }
0x11bd   :  { %v555_v46 = vmul.f32 %v553_v20, %v536_v19 }
0x11bf   :  { %561 = vrot.lane.b32.xlu1 %v555_v46, %s708_s22  ;;  %557 = vrot.lane.b32.xlu0 %v555_v46, %s707_s21 }
0x11c4   :  { %v427_v29 = vpop.permute.xlu1 %426 }
0x11c5   :  { %429 = vst.msk [vmem:[%s872_s2 + $0x4] sm:$0xf] %vm163_vm5, %v427_v29 }
0x11c6   :  { %492 = vst.msk [vmem:[%s872_s2 + $0x4] sm:$0xf] %vm227_vm6, %v821_v0 }
0x1231   :  { %v558_v30 = vpop.permute.xlu0 %557  ;;  %v562_v31 = vpop.permute.xlu1 %561 }
0x1232   :  { %560 = vst.msk [vmem:[%s872_s2 + $0x4] sm:$0xf] %vm296_vm7, %v558_v30 }
0x1233   :  { %564 = vst.msk [vmem:[#allocation2] sm:$0xf] %vm18_vm0, %v562_v31 }
0x1234   :  { %704 = dma.done.wait [#allocation5], 64  }
0x1235   :  { %705 = vsyncadd [#allocation5], 4294967232 }
0x1236   :  { %594 = vsyncpa [#allocation5], 1 }

</bundles_post_ra>
